<compile_context>
chip_gen: v6e
topology: v6e:2x2x1
jax: 0.10.0
libtpu: 0.0.40
codegen_flags: <defaults>
</compile_context>

<pallas_src>
import jax
import jax.numpy as jnp
from jax import lax
from jax.experimental import pallas as pl
from jax.experimental.pallas import tpu as pltpu

SLOPE = 0.15
SLOPE2 = SLOPE * SLOPE   # LReLU(LReLU(v)) == where(v > 0, v, SLOPE^2 * v)


def _lrelu(v):
    return jnp.where(v > 0, v, SLOPE * v)


def _lrelu2(v):
    # Collapsed double LeakyReLU (one select instead of two).
    return jnp.where(v > 0, v, SLOPE2 * v)


def unet_kernel(x_ref, w_cat_ref, b_cat_ref, w_mid_ref, b_mid_ref,
                w_out_ref, b_out_ref, w_dec_ref, b_dec_ref, o_ref):
    # Transposed layout: x is (D, TILE_M); M sits on the lane axis.
    x = x_ref[...]                                   # (D, TM) f32
    x_bf = x.astype(jnp.bfloat16)                    # bf16 operands for the MXU

    L = w_mid_ref.shape[0]                           # latent dim (multiple of 8)

    # Fused [input_embedding ; in_block-linear]: one (2L, D) @ (D, TM) bf16 matmul.
    latcat = jnp.dot(w_cat_ref[...], x_bf,
                     preferred_element_type=jnp.float32) + b_cat_ref[...]   # (2L, TM) f32
    latent = latcat[:L, :]                           # input_embedding output (residual source)
    h = _lrelu2(latcat[L:, :])                       # in_block linear -> double LReLU

    # middle_block (dense + LReLU) + extra activation.
    h = _lrelu2(jnp.dot(w_mid_ref[...], h.astype(jnp.bfloat16),
                        preferred_element_type=jnp.float32) + b_mid_ref[...])
    # out_block + extra activation.
    h = _lrelu2(jnp.dot(w_out_ref[...], h.astype(jnp.bfloat16),
                        preferred_element_type=jnp.float32) + b_out_ref[...])
    u = h + latent                                   # UNet_block residual (f32)

    # output_embedding: Linear(L -> D-2), weights zero-padded to D output rows.
    y = jnp.dot(w_dec_ref[...], u.astype(jnp.bfloat16),
                preferred_element_type=jnp.float32) + b_dec_ref[...]        # (D, TM), last 2 rows == 0

    D = x_ref.shape[0]
    row = lax.broadcasted_iota(jnp.int32, x.shape, 0)
    keep = row < (D - 2)
    # rows < D-2: y + x   (residual over the first D-2 input features)
    # last 2 rows: x      (torch.cat((output, x[..., -2:]), dim=-1))
    o_ref[...] = jnp.where(keep, y + x, x).astype(o_ref.dtype)


def _round_up(n, m):
    return ((n + m - 1) // m) * m


def _choose_tile_m(m, requested=2048):
    """Pick a lane-tile size: multiple of 128, <= 8192 (v7x VMEM headroom), balanced,
    and giving >= 2 grid steps for large M so both v7x TensorCores stay busy."""
    tm = max(128, min(8192, (requested // 128) * 128))
    m128 = _round_up(max(m, 1), 128)
    if m128 <= tm:
        return m128                                   # one tile covers everything
    n_tiles = max(2, pl.cdiv(m128, tm))
    return max(128, _round_up(pl.cdiv(m128, n_tiles), 128))


def unet_forward_fm(x_fm, kp, tile_m=2048):
    """Feature-major entry point (preferred): x_fm is (D, M) float32, returns (D, M).
    No wrapper-side transposes — keep the surrounding model feature-major to use this."""
    D, M = x_fm.shape
    tm = _choose_tile_m(M, tile_m)
    n_tiles = pl.cdiv(M, tm)
    m_pad = n_tiles * tm
    if m_pad > M:
        # TODO(synk): for production keep M tile-aligned (or rely on Pallas ragged
        # last-block clipping) so this full-copy pad disappears.
        x_fm = jnp.pad(x_fm, ((0, 0), (0, m_pad - M)))

    args = (x_fm,
            kp["w_cat"], kp["b_cat"],
            kp["w_mid"], kp["b_mid"],
            kp["w_out"], kp["b_out"],
            kp["w_dec"], kp["b_dec"])

    # Weights/biases: full-array blocks with a constant index_map -> VMEM-resident.
    def const_spec(a):
        return pl.BlockSpec(a.shape, lambda i: (0,) * a.ndim)

    in_specs = [pl.BlockSpec((D, tm), lambda i: (0, i))] + \
               [const_spec(a) for a in args[1:]]
    out_spec = pl.BlockSpec((D, tm), lambda i: (0, i))

    L = kp["w_mid"].shape[0]
    param_bytes = sum(int(a.size) * a.dtype.itemsize for a in args[1:])
    cost = pl.CostEstimate(
        flops=2 * m_pad * (3 * L * D + 2 * L * L),
        transcendentals=0,
        bytes_accessed=2 * m_pad * D * x_fm.dtype.itemsize + param_bytes,
    )

    out = pl.pallas_call(
        unet_kernel,
        out_shape=jax.ShapeDtypeStruct((D, m_pad), x_fm.dtype),
        grid_spec=pltpu.PrefetchScalarGridSpec(
            num_scalar_prefetch=0,
            grid=(n_tiles,),
            in_specs=in_specs,
            out_specs=out_spec,
        ),
        compiler_params=pltpu.CompilerParams(
            dimension_semantics=("parallel",),      # shard row tiles across TCs (v7x)
            vmem_limit_bytes=32 * 1024 * 1024,      # safe on v5e/v6e/v7x; tiles are tiny
        ),
        cost_estimate=cost,
    )(*args)

    return out[:, :M] if m_pad > M else out


def unet_forward(x, kp, tile_m=2048):
    """(B, T, D) convenience wrapper around the feature-major kernel.
    The reshape is free; the two transposes are real HBM passes — prefer
    unet_forward_fm if the surrounding model can stay feature-major."""
    B, T, D = x.shape
    x_fm = x.reshape(B * T, D).T
    out_fm = unet_forward_fm(x_fm, kp, tile_m=tile_m)
    return out_fm.T.reshape(B, T, D)


def init_params(key, D, L):
    """Deterministic f32 parameters in PyTorch-native (out, in) layout."""
    assert L % 8 == 0, "latent_dim should be a multiple of 8 (sublane alignment)"
    ks = jax.random.split(key, 10)
    s = 0.1

    def w(k, o, i):
        return (s * jax.random.normal(k, (o, i))).astype(jnp.float32)

    def b(k, o):
        return (s * jax.random.normal(k, (o, 1))).astype(jnp.float32)

    p = {
        "w_emb": w(ks[0], L, D), "b_emb": b(ks[1], L),      # input_embedding: Linear(D, L)
        "w_in":  w(ks[2], L, L), "b_in":  b(ks[3], L),      # UNet_block.in_block
        "w_mid": w(ks[4], L, L), "b_mid": b(ks[5], L),      # middle_block (dense+LReLU)
        "w_out": w(ks[6], L, L), "b_out": b(ks[7], L),      # UNet_block.out_block
    }
    # output_embedding: Linear(L, D-2), zero-padded to D output rows.
    w_dec = w(ks[8], D - 2, L)
    b_dec = b(ks[9], D - 2)
    p["w_dec_pad"] = jnp.pad(w_dec, ((0, 2), (0, 0)))
    p["b_dec_pad"] = jnp.pad(b_dec, ((0, 2), (0, 0)))
    return p


def prepare_params(p):
    """Kernel-ready params: fuse input_embedding with in_block's Linear (exact, in f32)
    and pre-cast all matmul weights to bf16 (biases stay f32)."""
    w_fused = p["w_in"] @ p["w_emb"]                          # (L, D) f32
    b_fused = p["w_in"] @ p["b_emb"] + p["b_in"]              # (L, 1) f32
    w_cat = jnp.concatenate([p["w_emb"], w_fused], axis=0)    # (2L, D)
    b_cat = jnp.concatenate([p["b_emb"], b_fused], axis=0)    # (2L, 1)
    bf = jnp.bfloat16
    return {
        "w_cat": w_cat.astype(bf),          "b_cat": b_cat,
        "w_mid": p["w_mid"].astype(bf),     "b_mid": p["b_mid"],
        "w_out": p["w_out"].astype(bf),     "b_out": p["b_out"],
        "w_dec": p["w_dec_pad"].astype(bf), "b_dec": p["b_dec_pad"],
    }


def unet_reference(x, p):
    """Pure-JAX f32 reference of the same forward (sanity check), batch-major layout."""
    latent = x @ p["w_emb"].T + p["b_emb"][:, 0]
    h = _lrelu(_lrelu(latent @ p["w_in"].T + p["b_in"][:, 0]))
    h = _lrelu(_lrelu(h @ p["w_mid"].T + p["b_mid"][:, 0]))
    h = _lrelu(_lrelu(h @ p["w_out"].T + p["b_out"][:, 0]))
    u = h + latent
    y = u @ p["w_dec_pad"][:-2].T + p["b_dec_pad"][:-2, 0]
    y = y + x[:, :, :-2]
    return jnp.concatenate([y, x[:, :, -2:]], axis=-1)


if __name__ == "__main__":
    B, T, D = 2, 4, 16          # batch, time steps, feature dim (last 2 feats carried through)
    L = 32                      # latent_dim

    key = jax.random.PRNGKey(0)
    kx, kp = jax.random.split(key)
    x = jax.random.normal(kx, (B, T, D), dtype=jnp.float32)
    params = init_params(kp, D, L)
    kparams = prepare_params(params)

    out = jax.block_until_ready(unet_forward(x, kparams))

    ref = unet_reference(x, params)
    assert out.shape == (B, T, D)
    # bf16 matmul operands (f32 accumulation / elementwise) -> loosened tolerance.
    assert jnp.allclose(out, ref, rtol=2e-2, atol=2e-2), "mismatch vs reference"

    print("KERNEL_OK")
</pallas_src>

<mosaic_0001>
module attributes {stable_mosaic.version = 11 : i64} {
  func.func @unet_kernel(%arg0: i32, %arg1: memref<16x128xf32, #tpu.memory_space<vmem>>, %arg2: memref<64x16xbf16, #tpu.memory_space<vmem>>, %arg3: memref<64x1xf32, #tpu.memory_space<vmem>>, %arg4: memref<32x32xbf16, #tpu.memory_space<vmem>>, %arg5: memref<32x1xf32, #tpu.memory_space<vmem>>, %arg6: memref<32x32xbf16, #tpu.memory_space<vmem>>, %arg7: memref<32x1xf32, #tpu.memory_space<vmem>>, %arg8: memref<16x32xbf16, #tpu.memory_space<vmem>>, %arg9: memref<16x1xf32, #tpu.memory_space<vmem>>, %arg10: memref<16x128xf32, #tpu.memory_space<vmem>>) attributes {dimension_semantics = [#tpu.dimension_semantics<parallel>], iteration_bounds = array<i64: 1>, scalar_prefetch = 0 : i64, scratch_operands = 0 : i64, tpu.core_type = #tpu.core_type<tc>, window_params = [{transform_indices = @transform_0, window_bounds = array<i64: 16, 128>}, {pipeline_mode = #tpu.pipeline_mode<synchronous>, transform_indices = @transform_1, window_bounds = array<i64: 64, 16>}, {pipeline_mode = #tpu.pipeline_mode<synchronous>, transform_indices = @transform_2, window_bounds = array<i64: 64, 1>}, {pipeline_mode = #tpu.pipeline_mode<synchronous>, transform_indices = @transform_3, window_bounds = array<i64: 32, 32>}, {pipeline_mode = #tpu.pipeline_mode<synchronous>, transform_indices = @transform_4, window_bounds = array<i64: 32, 1>}, {pipeline_mode = #tpu.pipeline_mode<synchronous>, transform_indices = @transform_5, window_bounds = array<i64: 32, 32>}, {pipeline_mode = #tpu.pipeline_mode<synchronous>, transform_indices = @transform_6, window_bounds = array<i64: 32, 1>}, {pipeline_mode = #tpu.pipeline_mode<synchronous>, transform_indices = @transform_7, window_bounds = array<i64: 16, 32>}, {pipeline_mode = #tpu.pipeline_mode<synchronous>, transform_indices = @transform_8, window_bounds = array<i64: 16, 1>}, {transform_indices = @transform_9, window_bounds = array<i64: 16, 128>}]} {
    %c0 = arith.constant 0 : index
    %c0_0 = arith.constant 0 : index
    %0 = vector.load %arg1[%c0, %c0_0] : memref<16x128xf32, #tpu.memory_space<vmem>>, vector<16x128xf32>
    %1 = arith.truncf %0 : vector<16x128xf32> to vector<16x128xbf16>
    %c0_1 = arith.constant 0 : index
    %c0_2 = arith.constant 0 : index
    %2 = vector.load %arg2[%c0_1, %c0_2] : memref<64x16xbf16, #tpu.memory_space<vmem>>, vector<64x16xbf16>
    %cst = arith.constant dense<0.000000e+00> : vector<64x128xf32>
    %3 = tpu.matmul %2, %1, %cst {dimension_numbers = #tpu.dot_dimension_numbers<[1], [0], [0], [1], [0, 0, 1, 1], [], []>} : vector<64x16xbf16>, vector<16x128xbf16>, vector<64x128xf32> -> vector<64x128xf32>
    %c0_3 = arith.constant 0 : index
    %c0_4 = arith.constant 0 : index
    %4 = vector.load %arg3[%c0_3, %c0_4] : memref<64x1xf32, #tpu.memory_space<vmem>>, vector<64x1xf32>
    %5 = vector.broadcast %4 : vector<64x1xf32> to vector<64x128xf32>
    %6 = arith.addf %3, %5 : vector<64x128xf32>
    %7 = vector.extract_strided_slice %6 {offsets = [0, 0], sizes = [32, 128], strides = [1, 1]} : vector<64x128xf32> to vector<32x128xf32>
    %8 = vector.extract_strided_slice %6 {offsets = [32, 0], sizes = [32, 128], strides = [1, 1]} : vector<64x128xf32> to vector<32x128xf32>
    %cst_5 = arith.constant 0.000000e+00 : f32
    %9 = vector.broadcast %cst_5 : f32 to vector<32x128xf32>
    %10 = arith.cmpf ogt, %8, %9 : vector<32x128xf32>
    %cst_6 = arith.constant 2.250000e-02 : f32
    %11 = vector.broadcast %cst_6 : f32 to vector<32x128xf32>
    %12 = arith.mulf %11, %8 : vector<32x128xf32>
    %13 = arith.select %10, %8, %12 : vector<32x128xi1>, vector<32x128xf32>
    %c0_7 = arith.constant 0 : index
    %c0_8 = arith.constant 0 : index
    %14 = vector.load %arg4[%c0_7, %c0_8] : memref<32x32xbf16, #tpu.memory_space<vmem>>, vector<32x32xbf16>
    %15 = arith.truncf %13 : vector<32x128xf32> to vector<32x128xbf16>
    %cst_9 = arith.constant dense<0.000000e+00> : vector<32x128xf32>
    %16 = tpu.matmul %14, %15, %cst_9 {dimension_numbers = #tpu.dot_dimension_numbers<[1], [0], [0], [1], [0, 0, 1, 1], [], []>} : vector<32x32xbf16>, vector<32x128xbf16>, vector<32x128xf32> -> vector<32x128xf32>
    %c0_10 = arith.constant 0 : index
    %c0_11 = arith.constant 0 : index
    %17 = vector.load %arg5[%c0_10, %c0_11] : memref<32x1xf32, #tpu.memory_space<vmem>>, vector<32x1xf32>
    %18 = vector.broadcast %17 : vector<32x1xf32> to vector<32x128xf32>
    %19 = arith.addf %16, %18 : vector<32x128xf32>
    %cst_12 = arith.constant 0.000000e+00 : f32
    %20 = vector.broadcast %cst_12 : f32 to vector<32x128xf32>
    %21 = arith.cmpf ogt, %19, %20 : vector<32x128xf32>
    %cst_13 = arith.constant 2.250000e-02 : f32
    %22 = vector.broadcast %cst_13 : f32 to vector<32x128xf32>
    %23 = arith.mulf %22, %19 : vector<32x128xf32>
    %24 = arith.select %21, %19, %23 : vector<32x128xi1>, vector<32x128xf32>
    %c0_14 = arith.constant 0 : index
    %c0_15 = arith.constant 0 : index
    %25 = vector.load %arg6[%c0_14, %c0_15] : memref<32x32xbf16, #tpu.memory_space<vmem>>, vector<32x32xbf16>
    %26 = arith.truncf %24 : vector<32x128xf32> to vector<32x128xbf16>
    %cst_16 = arith.constant dense<0.000000e+00> : vector<32x128xf32>
    %27 = tpu.matmul %25, %26, %cst_16 {dimension_numbers = #tpu.dot_dimension_numbers<[1], [0], [0], [1], [0, 0, 1, 1], [], []>} : vector<32x32xbf16>, vector<32x128xbf16>, vector<32x128xf32> -> vector<32x128xf32>
    %c0_17 = arith.constant 0 : index
    %c0_18 = arith.constant 0 : index
    %28 = vector.load %arg7[%c0_17, %c0_18] : memref<32x1xf32, #tpu.memory_space<vmem>>, vector<32x1xf32>
    %29 = vector.broadcast %28 : vector<32x1xf32> to vector<32x128xf32>
    %30 = arith.addf %27, %29 : vector<32x128xf32>
    %cst_19 = arith.constant 0.000000e+00 : f32
    %31 = vector.broadcast %cst_19 : f32 to vector<32x128xf32>
    %32 = arith.cmpf ogt, %30, %31 : vector<32x128xf32>
    %cst_20 = arith.constant 2.250000e-02 : f32
    %33 = vector.broadcast %cst_20 : f32 to vector<32x128xf32>
    %34 = arith.mulf %33, %30 : vector<32x128xf32>
    %35 = arith.select %32, %30, %34 : vector<32x128xi1>, vector<32x128xf32>
    %36 = arith.addf %35, %7 : vector<32x128xf32>
    %c0_21 = arith.constant 0 : index
    %c0_22 = arith.constant 0 : index
    %37 = vector.load %arg8[%c0_21, %c0_22] : memref<16x32xbf16, #tpu.memory_space<vmem>>, vector<16x32xbf16>
    %38 = arith.truncf %36 : vector<32x128xf32> to vector<32x128xbf16>
    %cst_23 = arith.constant dense<0.000000e+00> : vector<16x128xf32>
    %39 = tpu.matmul %37, %38, %cst_23 {dimension_numbers = #tpu.dot_dimension_numbers<[1], [0], [0], [1], [0, 0, 1, 1], [], []>} : vector<16x32xbf16>, vector<32x128xbf16>, vector<16x128xf32> -> vector<16x128xf32>
    %c0_24 = arith.constant 0 : index
    %c0_25 = arith.constant 0 : index
    %40 = vector.load %arg9[%c0_24, %c0_25] : memref<16x1xf32, #tpu.memory_space<vmem>>, vector<16x1xf32>
    %41 = vector.broadcast %40 : vector<16x1xf32> to vector<16x128xf32>
    %42 = arith.addf %39, %41 : vector<16x128xf32>
    %43 = tpu.iota {dimensions = array<i32: 0>} : vector<16x128xi32>
    %c14_i32 = arith.constant 14 : i32
    %44 = vector.broadcast %c14_i32 : i32 to vector<16x128xi32>
    %45 = arith.cmpi slt, %43, %44 : vector<16x128xi32>
    %46 = arith.addf %42, %0 : vector<16x128xf32>
    %47 = arith.select %45, %46, %0 : vector<16x128xi1>, vector<16x128xf32>
    %c0_26 = arith.constant 0 : index
    %c0_27 = arith.constant 0 : index
    %48 = vector.load %arg10[%c0_26, %c0_27] : memref<16x128xf32, #tpu.memory_space<vmem>>, vector<16x128xf32>
    tpu.vector_store %arg10[%c0_26, %c0_27], %47 {strides = array<i32>} : memref<16x128xf32, #tpu.memory_space<vmem>>, vector<16x128xf32>,
    return
  }
  func.func @transform_0(%arg0: i32) -> (i32, i32) {
    %c0_i32 = arith.constant 0 : i32
    %c0_i32_0 = arith.constant 0 : i32
    return %c0_i32, %arg0 : i32, i32
  }
  func.func @transform_1(%arg0: i32) -> (i32, i32) {
    %c0_i32 = arith.constant 0 : i32
    %c0_i32_0 = arith.constant 0 : i32
    %c0_i32_1 = arith.constant 0 : i32
    return %c0_i32, %c0_i32_0 : i32, i32
  }
  func.func @transform_2(%arg0: i32) -> (i32, i32) {
    %c0_i32 = arith.constant 0 : i32
    %c0_i32_0 = arith.constant 0 : i32
    %c0_i32_1 = arith.constant 0 : i32
    return %c0_i32, %c0_i32_0 : i32, i32
  }
  func.func @transform_3(%arg0: i32) -> (i32, i32) {
    %c0_i32 = arith.constant 0 : i32
    %c0_i32_0 = arith.constant 0 : i32
    %c0_i32_1 = arith.constant 0 : i32
    return %c0_i32, %c0_i32_0 : i32, i32
  }
  func.func @transform_4(%arg0: i32) -> (i32, i32) {
    %c0_i32 = arith.constant 0 : i32
    %c0_i32_0 = arith.constant 0 : i32
    %c0_i32_1 = arith.constant 0 : i32
    return %c0_i32, %c0_i32_0 : i32, i32
  }
  func.func @transform_5(%arg0: i32) -> (i32, i32) {
    %c0_i32 = arith.constant 0 : i32
    %c0_i32_0 = arith.constant 0 : i32
    %c0_i32_1 = arith.constant 0 : i32
    return %c0_i32, %c0_i32_0 : i32, i32
  }
  func.func @transform_6(%arg0: i32) -> (i32, i32) {
    %c0_i32 = arith.constant 0 : i32
    %c0_i32_0 = arith.constant 0 : i32
    %c0_i32_1 = arith.constant 0 : i32
    return %c0_i32, %c0_i32_0 : i32, i32
  }
  func.func @transform_7(%arg0: i32) -> (i32, i32) {
    %c0_i32 = arith.constant 0 : i32
    %c0_i32_0 = arith.constant 0 : i32
    %c0_i32_1 = arith.constant 0 : i32
    return %c0_i32, %c0_i32_0 : i32, i32
  }
  func.func @transform_8(%arg0: i32) -> (i32, i32) {
    %c0_i32 = arith.constant 0 : i32
    %c0_i32_0 = arith.constant 0 : i32
    %c0_i32_1 = arith.constant 0 : i32
    return %c0_i32, %c0_i32_0 : i32, i32
  }
  func.func @transform_9(%arg0: i32) -> (i32, i32) {
    %c0_i32 = arith.constant 0 : i32
    %c0_i32_0 = arith.constant 0 : i32
    return %c0_i32, %arg0 : i32, i32
  }
}

</mosaic_0001>

<bundles_post_ra>
// kernel: tpu_custom_call.1
= control target key start
LH: loop header
LB: loop body
LE: loop exit
PB: predicated region body
PF: predicated region fallthrough
CT: control target
= control target key end

     0   :  { %vm113_vm0 = vcmask 130048   ;;  %v621_v4 = vmov 0   ;;  %s797_s0 = inlined_call_operand.vmem [shape: f32[16,128], index: 0, kind: input, shape index: {}]   ;;  %s798_s1 = inlined_call_operand.vmem [shape: bf16[64,16], index: 1, kind: input, shape index: {}]   ;;  %s799_s2 = inlined_call_operand.vmem [shape: f32[64,1], index: 2, kind: input, shape index: {}]   ;;  %s800_s3 = inlined_call_operand.vmem [shape: bf16[32,32], index: 3, kind: input, shape index: {}]   ;;  %s801_s4 = inlined_call_operand.vmem [shape: f32[32,1], index: 4, kind: input, shape index: {}]   ;;  %s802_s5 = inlined_call_operand.vmem [shape: bf16[32,32], index: 5, kind: input, shape index: {}]   ;;  %s803_s6 = inlined_call_operand.vmem [shape: f32[32,1], index: 6, kind: input, shape index: {}]   ;;  %s804_s7 = inlined_call_operand.vmem [shape: bf16[16,32], index: 7, kind: input, shape index: {}]   ;;  %s805_s8 = inlined_call_operand.vmem [shape: f32[16,1], index: 8, kind: input, shape index: {}]   ;;  %s806_s9 = inlined_call_operand.hbm [shape: f32[16,128], index: 9, kind: output, shape index: {}]  }
   0x1   :  { %v680_v0 = vld [vmem:[%s797_s0] sm:$0xff]  ;;  %v685_v1 = vld [vmem:[%s797_s0 + $0x8] sm:$0xff]  ;;  %588 = vset.pattern.permute.xlu0 %v621_v4  ;;  %589 = vset.pattern.permute.xlu1 %v621_v4  ;;  %v592_v6 = vld [vmem:[%s798_s1 + $0x10] sm:$0xff]  }
   0x2   :  { %v36_v2 = vpack.c.bf16 %v685_v1, %v680_v0  ;;  %v590_v3 = vld [vmem:[%s798_s1] sm:$0xff]   ;;  %v591_v5 = vld [vmem:[%s798_s1 + $0x8] sm:$0xff]   ;;  %v51_v7 = vld [vmem:[%s799_s2 + $0x30] sm:$0xff] }
   0x3   :  { %550 = vmatprep.mubr.msk.bf16.mxu0 %vm113_vm0, %v590_v3  ;;  %85 = vperm.xlu0 %588, %v51_v7   ;;  %v49_v8 = vld [vmem:[%s799_s2 + $0x20] sm:$0xff]  ;;  %v52_v9 = vld [vmem:[%s799_s2 + $0x38] sm:$0xff]  ;;  %v50_v10 = vld [vmem:[%s799_s2 + $0x28] sm:$0xff] }
   0x4   :  { %548 = vmatprep.subr.bf16.mxu0 %v36_v2  ;;  %75 = vperm.xlu1 %589, %v49_v8   ;;  %v593_v11 = vld [vmem:[%s798_s1 + $0x18] sm:$0xff]   ;;  %v211_v12 = vld [vmem:[%s801_s4 + $0x10] sm:$0xff]  ;;  %v209_v14 = vld [vmem:[%s801_s4] sm:$0xff] }
   0x5   :  { %549 = vmatpush3.bf16.msra.mxu0 %v36_v2  ;;  %v212_v13 = vld [vmem:[%s801_s4 + $0x18] sm:$0xff] }
   0x7   :  { %90 = vperm.xlu0 %588, %v52_v9  }
   0x8   :  { %551 = vmatmul.mubr.msk.bf16.vlgmr.msra.gmra.mxu0 %vm113_vm0, %v591_v5  ;;  %80 = vperm.xlu1 %589, %v50_v10  }
   0x9   :  { %554 = vmatprep.mubr.msk.bf16.mxu0 %vm113_vm0, %v592_v6 }
   0xb   :  { %225 = vperm.xlu0 %588, %v211_v12  }
   0xc   :  { %230 = vperm.xlu1 %589, %v212_v13  }
   0xd   :  { %14 = vsyncpa [#allocation3], 0  ;;  %v210_v15 = vld [vmem:[%s801_s4 + $0x8] sm:$0xff]  ;;  %v319_v16 = vld [vmem:[%s803_s6 + $0x10] sm:$0xff]  ;;  %vm243_vm1 = vcmask 261120   ;;  %vm623_vm10 = vmmov 0  }
   0xe   :  { %v320_v17 = vld [vmem:[%s803_s6 + $0x18] sm:$0xff]  ;;  %v47_v18 = vld [vmem:[%s799_s2 + $0x10] sm:$0xff]  ;;  %v317_v20 = vld [vmem:[%s803_s6] sm:$0xff]  ;;  %s624_s15 = smov [#allocation2]  }
   0xf   :  { %215 = vperm.xlu0 %588, %v209_v14   ;;  %v48_v19 = vld [vmem:[%s799_s2 + $0x18] sm:$0xff]  ;;  %v318_v21 = vld [vmem:[%s803_s6 + $0x8] sm:$0xff]  ;;  %v45_v22 = vld [vmem:[%s799_s2] sm:$0xff]  ;;  %s503_s16 = sshll.u32 %s624_s15, 4  ;;  %s504_s16 = int_to_ptr.vmem [resolvable:$true] %s503_s16 }
  0x10   :  { %555 = vmatmul.mubr.msk.bf16.gmra.mxu0 %vm113_vm0, %v593_v11  ;;  %220 = vperm.xlu1 %589, %v210_v15   ;;  %v46_v23 = vld [vmem:[%s799_s2 + $0x8] sm:$0xff]  ;;  %v426_v25 = vld [vmem:[%s805_s8] sm:$0xff]  ;;  %p604_p1 = scmp.lt.s32.totalorder %s504_s16, %s504_s16 }
  0x11   :  { %v427_v24 = vld [vmem:[%s805_s8 + $0x8] sm:$0xff]  ;;  %v594_v26 = vld [vmem:[%s800_s3] sm:$0xff]  }
  0x12   :  { %562 = vmatprep.mubr.msk.bf16.mxu1 %vm243_vm1, %v594_v26  ;;  %v595_v53 = vld [vmem:[%s800_s3 + $0x8] sm:$0xff]   ;;  %v596_v54 = vld [vmem:[%s802_s5] sm:$0xff]  }
  0x13   :  { %333 = vperm.xlu0 %588, %v319_v16   ;;  %v597_v15 = vld [vmem:[%s802_s5 + $0x8] sm:$0xff]   ;;  %v622_v16 = vmov 0.0  }
  0x14   :  { %338 = vperm.xlu1 %589, %v320_v17   ;;  %574 = vmatprep.subr.bf16.mxu0 %v622_v16 }
  0x15   :  { %578 = vmatprep.mubr.msk.bf16.mxu0 %vm623_vm10, %v622_v16 }
  0x17   :  { %65 = vperm.xlu0 %588, %v47_v18  }
  0x18   :  { %70 = vperm.xlu1 %589, %v48_v19  }
  0x1b   :  { %323 = vperm.xlu0 %588, %v317_v20  }
  0x1c   :  { %328 = vperm.xlu1 %589, %v318_v21  }
  0x1f   :  { %55 = vperm.xlu0 %588, %v45_v22  }
  0x20   :  { %60 = vperm.xlu1 %589, %v46_v23  }
  0x23   :  { %435 = vperm.xlu0 %588, %v427_v24  }
  0x24   :  { %430 = vperm.xlu1 %589, %v426_v25  }
  0x7e   :  { %v86_v30 = vpop.permute.xlu0 %85 }
  0x7f   :  { %v76_v32 = vpop.permute.xlu1 %75 }
  0x82   :  { %v91_v37 = vpop.permute.xlu0 %90 }
  0x83   :  { %v81_v41 = vpop.permute.xlu1 %80 }
  0x86   :  { %v226_v55 = vpop.permute.xlu0 %225 }
  0x87   :  { %v231_v56 = vpop.permute.xlu1 %230 }
  0x8a   :  { %v216_v59 = vpop.permute.xlu0 %215 }
  0x8b   :  { %v221_v3 = vpop.permute.xlu1 %220 }
  0x8e   :  { %v334_v17 = vpop.permute.xlu0 %333 }
  0x8f   :  { %v339_v18 = vpop.permute.xlu1 %338 }
  0x92   :  { %v66_v19 = vpop.permute.xlu0 %65 }
  0x93   :  { %v71_v20 = vpop.permute.xlu1 %70 }
  0x96   :  { %v324_v22 = vpop.permute.xlu0 %323 }
  0x97   :  { %v329_v23 = vpop.permute.xlu1 %328 }
  0xc8   :  { %v763_v27 = vpop.f32.mrf.mxu0 }
  0xca   :  { %v765_v28 = vpop.f32.mrf.mxu0 }
  0xcc   :  { %v767_v29 = vpop.f32.mrf.mxu0 }
  0xce   :  { %v769_v31 = vpop.f32.mrf.mxu0 }
  0xd0   :  { %v556_v33 = vpop.f32.mrf.mxu0 }
  0xd1   :  { %v185_v34 = vadd.f32 %v556_v33, %v86_v30 }
  0xd2   :  { %v176_v35 = vpop.f32.mrf.mxu0 }
  0xd3   :  { %v177_v36 = vadd.f32 %v176_v35, %v76_v32  ;;  %v197_v39 = vmul.f32 0.0225, %v185_v34  ;;  %vm193_vm2 = vcmp.gt.f32.partialorder %v185_v34, 0.0 }
  0xd4   :  { %v557_v38 = vpop.f32.mrf.mxu0 }
  0xd5   :  { %v188_v40 = vadd.f32 %v557_v38, %v91_v37  ;;  %v195_v43 = vmul.f32 0.0225, %v177_v36  ;;  %vm191_vm4 = vcmp.gt.f32.partialorder %v177_v36, 0.0  ;;  %v201_v47 = vsel %vm193_vm2, %v185_v34, %v197_v39  ;;  %v61_v37 = vpop.permute.xlu1 %60 }
  0xd6   :  { %v179_v42 = vpop.f32.mrf.mxu0 }
  0xd7   :  { %v198_v44 = vmul.f32 0.0225, %v188_v40  ;;  %v180_v45 = vadd.f32 %v179_v42, %v81_v41  ;;  %vm194_vm3 = vcmp.gt.f32.partialorder %v188_v40, 0.0  ;;  %v199_v50 = vsel %vm191_vm4, %v177_v36, %v195_v43  ;;  %v56_v36 = vpop.permute.xlu0 %55 }
  0xd8   :  { %v169_v41 = vadd.f32 %v763_v27, %v66_v19  ;;  %v172_v42 = vadd.f32 %v767_v29, %v71_v20  ;;  %v598_v27 = vld [vmem:[%s804_s7] sm:$0xff]   ;;  %v487_v29 = vlaneseq  ;;  %s599_s7 = scalar_lea.vmem %s504_s16, 256 }
  0xd9   :  { %vm192_vm5 = vcmp.gt.f32.partialorder %v180_v45, 0.0  ;;  %v196_v46 = vmul.f32 0.0225, %v180_v45  ;;  %v202_v48 = vsel %vm194_vm3, %v188_v40, %v198_v44  ;;  %p600_p0 = scmp.ne.s32.totalorder %s504_s16, %s599_s7  ;;  %p605_p2 = scmp.lt.s32.totalorder %s599_s7, %s599_s7 }
  0xda   :  { %v208_v49 = vpack.c.bf16 %v202_v48, %v201_v47  ;;  %v164_v47 = vadd.f32 %v769_v31, %v61_v37 }
  0xdb   :  { %v200_v51 = vsel %vm192_vm5, %v180_v45, %v196_v46  ;;  %v161_v46 = vadd.f32 %v765_v28, %v56_v36  ;;  %v488_v28 = vshrl.u32 %v487_v29, 7  ;;  %p606_p3 = por %p605_p2, %p604_p1 }
  0xdc   :  { %558 = vmatprep.subr.bf16.mxu1 %v208_v49  ;;  %v207_v52 = vpack.c.bf16 %v200_v51, %v199_v50 }
  0xdd   :  { %559 = vmatpush3.bf16.msra.mxu1 %v208_v49  ;;  %p607_p4 = pnand %p606_p3, %p600_p0 }
  0xde   :  { %560 = vmatprep.subr.bf16.mxu1 %v207_v52 }
  0xe1   :  { %561 = vmatpush3.bf16.msra.mxu1 %v207_v52 }
  0xe4   :  { %563 = vmatmul.mubr.msk.bf16.vlgmr.msra.gmra.mxu1 %vm243_vm1, %v595_v53 }
  0xe5   :  { %570 = vmatprep.mubr.msk.bf16.mxu1 %vm243_vm1, %v596_v54 }
 0x1a4   :  { %v564_v57 = vpop.f32.mrf.mxu1 }
 0x1a5   :  { %v293_v58 = vadd.f32 %v564_v57, %v226_v55  ;;  %v431_v55 = vpop.permute.xlu1 %430 }
 0x1a6   :  { %v284_v60 = vpop.f32.mrf.mxu1 }
 0x1a7   :  { %v285_v61 = vadd.f32 %v284_v60, %v216_v59  ;;  %v305_v63 = vmul.f32 0.0225, %v293_v58  ;;  %vm301_vm6 = vcmp.gt.f32.partialorder %v293_v58, 0.0  ;;  %v436_v60 = vpop.permute.xlu0 %435 }
 0x1a8   :  { %v565_v62 = vpop.f32.mrf.mxu1 }
 0x1a9   :  { %v296_v2 = vadd.f32 %v565_v62, %v231_v56  ;;  %v303_v5 = vmul.f32 0.0225, %v285_v61  ;;  %vm299_vm8 = vcmp.gt.f32.partialorder %v285_v61, 0.0  ;;  %v309_v9 = vsel %vm301_vm6, %v293_v58, %v305_v63 }
 0x1aa   :  { %v287_v4 = vpop.f32.mrf.mxu1  ;;  %v489_v58 = vadd.s32 8, %v488_v28 }
 0x1ab   :  { %vm302_vm7 = vcmp.gt.f32.partialorder %v296_v2, 0.0  ;;  %v306_v6 = vmul.f32 0.0225, %v296_v2  ;;  %v288_v7 = vadd.f32 %v287_v4, %v221_v3  ;;  %v307_v12 = vsel %vm299_vm8, %v285_v61, %v303_v5 }
 0x1ac   :  { %vm491_vm15 = vcmp.lt.s32.totalorder %v489_v58, 14 }
 0x1ad   :  { %vm300_vm9 = vcmp.gt.f32.partialorder %v288_v7, 0.0  ;;  %v304_v8 = vmul.f32 0.0225, %v288_v7  ;;  %v310_v10 = vsel %vm302_vm7, %v296_v2, %v306_v6 }
 0x1ae   :  { %v316_v11 = vpack.c.bf16 %v310_v10, %v309_v9 }
 0x1af   :  { %v308_v13 = vsel %vm300_vm9, %v288_v7, %v304_v8 }
 0x1b0   :  { %566 = vmatprep.subr.bf16.mxu1 %v316_v11  ;;  %v315_v14 = vpack.c.bf16 %v308_v13, %v307_v12 }
 0x1b1   :  { %567 = vmatpush3.bf16.msra.mxu1 %v316_v11 }
 0x1b2   :  { %568 = vmatprep.subr.bf16.mxu1 %v315_v14 }
 0x1b5   :  { %569 = vmatpush3.bf16.msra.mxu1 %v315_v14 }
 0x1b8   :  { %571 = vmatmul.mubr.msk.bf16.vlgmr.msra.gmra.mxu1 %vm243_vm1, %v597_v15 }
 0x278   :  { %v572_v21 = vpop.f32.mrf.mxu1 }
 0x279   :  { %v400_v24 = vadd.f32 %v572_v21, %v334_v17 }
 0x27a   :  { %v391_v25 = vpop.f32.mrf.mxu1 }
 0x27b   :  { %v412_v26 = vmul.f32 0.0225, %v400_v24  ;;  %v392_v30 = vadd.f32 %v391_v25, %v324_v22  ;;  %vm408_vm11 = vcmp.gt.f32.partialorder %v400_v24, 0.0 }
 0x27c   :  { %v573_v32 = vpop.f32.mrf.mxu1 }
 0x27d   :  { %v410_v33 = vmul.f32 0.0225, %v392_v30  ;;  %v403_v34 = vadd.f32 %v573_v32, %v339_v18  ;;  %vm406_vm12 = vcmp.gt.f32.partialorder %v392_v30, 0.0  ;;  %v416_v38 = vsel %vm408_vm11, %v400_v24, %v412_v26 }
 0x27e   :  { %v394_v35 = vpop.f32.mrf.mxu1  ;;  %v420_v48 = vadd.f32 %v416_v38, %v169_v41 }
 0x27f   :  { %vm409_vm13 = vcmp.gt.f32.partialorder %v403_v34, 0.0  ;;  %v413_v39 = vmul.f32 0.0225, %v403_v34  ;;  %v395_v40 = vadd.f32 %v394_v35, %v329_v23  ;;  %v414_v43 = vsel %vm406_vm12, %v392_v30, %v410_v33 }
 0x280   :  { %v418_v51 = vadd.f32 %v414_v43, %v161_v46 }
 0x281   :  { %v417_v44 = vsel %vm409_vm13, %v403_v34, %v413_v39  ;;  %vm407_vm14 = vcmp.gt.f32.partialorder %v395_v40, 0.0  ;;  %v411_v45 = vmul.f32 0.0225, %v395_v40 }
 0x282   :  { %v421_v49 = vadd.f32 %v417_v44, %v172_v42 }
 0x283   :  { %v415_v50 = vsel %vm407_vm14, %v395_v40, %v411_v45 }
 0x284   :  { %v419_v52 = vadd.f32 %v415_v50, %v164_v47  ;;  %v425_v53 = vpack.c.bf16 %v421_v49, %v420_v48 }
 0x286   :  { %575 = vmatpush3.bf16.msra.mxu0 %v425_v53  ;;  %v424_v54 = vpack.c.bf16 %v419_v52, %v418_v51 }
 0x287   :  { %576 = vmatprep.subr.bf16.mxu0 %v622_v16 }
 0x28a   :  { %577 = vmatpush3.bf16.msra.mxu0 %v424_v54 }
 0x28d   :  { %579 = vmatmul.mubr.msk.bf16.vlgmr.msra.gmra.mxu0 %vm243_vm1, %v598_v27 }
 0x34d   :  { %v480_v31 = vpop.f32.mrf.mxu0 }
 0x34e   :  { %v481_v56 = vadd.f32 %v480_v31, %v431_v55 }
 0x34f   :  { %v580_v57 = vpop.f32.mrf.mxu0 }
 0x350   :  { %v492_v59 = vadd.f32 %v481_v56, %v680_v0 }
 0x351   :  { %v483_v61 = vpop.f32.mrf.mxu0 }
 0x352   :  { %496 = vst [vmem:[#allocation2] sm:$0xff] %v492_v59  ;;  %v484_v62 = vadd.f32 %v483_v61, %v436_v60 }
 0x353   :  { %v581_v63 = vpop.f32.mrf.mxu0 }
 0x354   :  { %v493_v2 = vadd.f32 %v484_v62, %v685_v1 }
 0x356   :  { %v495_v3 = vsel %vm491_vm15, %v493_v2, %v685_v1 }
 0x357   :  { %497 = vst [vmem:[#allocation2 + $0x8] sm:$0xff] %v495_v3 }
 0x358   :  { %610 = shalt.err (!%p607_p4)
}
 0x359   :  { %s625_s0 = smov 128   ;;  %s626_s17 = smov 8  }
 0x35a   :  { %509 = dma.vmem_to_hbm [thread:$0]  %s504_s16, 256, %s806_s9, [#allocation3], %s625_s0, %s625_s0, %s626_s17  }
 0x35b   :  { %619 = dma.done.wait [#allocation3], 256  }
 0x35c   :  { %620 = vsyncadd [#allocation3], 4294967040 }
 0x35d   :  { %513 = vsyncpa [#allocation3], 1 }

</bundles_post_ra>
